<compile_context>
chip_gen: v5e
topology: v5e:2x2
jax: 0.10.0
libtpu: 0.0.40
codegen_flags: <defaults>
</compile_context>

<pallas_src>
import jax
import jax.numpy as jnp
from jax.experimental import pallas as pl
from jax.experimental.pallas import tpu as pltpu

LANE = 128
SUBLANE = 8


def _round_up(x, m):
    return (x + m - 1) // m * m


def ffnn_kernel(x_ref, w1_ref, b1_ref, w2_ref, b2_ref, w3_ref, b3_ref, o_ref):
    cd = w1_ref.dtype
    # In-kernel cast of the streamed fp32 activations (VPU slot, free here).
    x = x_ref[...].astype(cd)
    # Layer0 + ReLU (Dropout p=0 is identity -> no-op)
    h1 = jnp.dot(x, w1_ref[...], preferred_element_type=jnp.float32)
    h1 = jnp.maximum(h1 + b1_ref[...], 0.0)
    # Layer1 + ReLU
    h2 = jnp.dot(h1.astype(cd), w2_ref[...], preferred_element_type=jnp.float32)
    h2 = jnp.maximum(h2 + b2_ref[...], 0.0)
    # Layer2, transposed: (8, E2) x (tb, E2)^T -> (8, tb); logits lane-dense
    # along batch. Rows 0 and 1 of w3_ref both carry the real weight column,
    # rows 2..7 are zero padding.
    out_t = jax.lax.dot_general(
        w3_ref[...], h2.astype(cd),
        dimension_numbers=(((1,), (1,)), ((), ())),
        preferred_element_type=jnp.float32)
    out_t = out_t + b3_ref[...]                       # (8, 1) broadcast over lanes
    # Fused epilogue: row 0 keeps raw logits, row 1 becomes sigmoid(logits)
    # (EUP slot is idle in this memory-bound kernel).
    row = jax.lax.broadcasted_iota(jnp.int32, out_t.shape, 0)
    o_ref[...] = jnp.where(row == 1, jax.nn.sigmoid(out_t), out_t).astype(o_ref.dtype)


def ffnn_forward(x, w1, b1, w2, b2, w3, b3, *, tb=1024,
                 compute_dtype=jnp.bfloat16):
    """Fused 3-layer MLP. Returns {'logits', 'preds'} like ffnn_layers.forward."""
    B, D_in = x.shape
    E1 = w1.shape[1]        # feat_embed_dim
    E2 = w2.shape[1]        # class_embed_dim
    D_out = w3.shape[1]
    assert D_out == 1, "ffnn_layers.layer2 projects to a single logit"

    # Final weight, transposed & sublane-padded to 8 rows: rows 0 and 1 both
    # hold the logit weight column so one lane-dense (8, tb) store carries
    # logits (row 0) and sigmoid(logits) (row 1).
    w3_t = jnp.zeros((SUBLANE, E2), w3.dtype)
    w3_t = w3_t.at[0, :].set(w3[:, 0]).at[1, :].set(w3[:, 0])
    b3_t = jnp.zeros((SUBLANE, 1), jnp.float32)
    b3_t = b3_t.at[0, 0].set(b3[0]).at[1, 0].set(b3[0])

    # Batch tile: multiple of 128 (output lane constraint). Cap so the grid has
    # >= 2 steps when the batch allows -> both v7x TensorCores get work.
    if B <= LANE:
        tb_eff = B                              # single full-extent block
    else:
        tb_eff = max(LANE, _round_up(pl.cdiv(B, 2), LANE))
        tb_eff = min(_round_up(tb, LANE), tb_eff)
    num_tiles = pl.cdiv(B, tb_eff)
    grid = (num_tiles,)
    # No wrapper-side pad/cast of x: ragged last block is masked by Pallas and
    # the compute_dtype cast happens in-kernel.

    w1_c = w1.astype(compute_dtype)
    w2_c = w2.astype(compute_dtype)
    w3_c = w3_t.astype(compute_dtype)
    b1_c = b1.reshape(1, E1).astype(jnp.float32)   # biases stay fp32 (epilogue adds)
    b2_c = b2.reshape(1, E2).astype(jnp.float32)
    b3_c = b3_t

    itemsize = jnp.dtype(compute_dtype).itemsize
    B_work = num_tiles * tb_eff
    cost = pl.CostEstimate(
        flops=2 * B_work * (D_in * E1 + E1 * E2 + E2 * SUBLANE),
        transcendentals=B_work * SUBLANE,                       # fused sigmoid
        bytes_accessed=(B * D_in * 4                            # x, streamed fp32
                        + (D_in * E1 + E1 * E2 + SUBLANE * E2) * itemsize
                        + (E1 + E2 + SUBLANE) * 4               # biases
                        + SUBLANE * B * 4),                     # (8, B) fp32 output
    )

    out_t = pl.pallas_call(
        ffnn_kernel,
        out_shape=jax.ShapeDtypeStruct((SUBLANE, B), jnp.float32),
        grid_spec=pltpu.PrefetchScalarGridSpec(
            num_scalar_prefetch=0,
            grid=grid,
            in_specs=[
                pl.BlockSpec((tb_eff, D_in), lambda i: (i, 0)),   # x tile (fp32)
                pl.BlockSpec((D_in, E1), lambda i: (0, 0)),       # W0 (resident)
                pl.BlockSpec((1, E1), lambda i: (0, 0)),          # b0
                pl.BlockSpec((E1, E2), lambda i: (0, 0)),         # W1 (resident)
                pl.BlockSpec((1, E2), lambda i: (0, 0)),          # b1
                pl.BlockSpec((SUBLANE, E2), lambda i: (0, 0)),    # W2^T rows (resident)
                pl.BlockSpec((SUBLANE, 1), lambda i: (0, 0)),     # b2 rows
            ],
            out_specs=pl.BlockSpec((SUBLANE, tb_eff), lambda i: (0, i)),
        ),
        compiler_params=pltpu.CompilerParams(
            dimension_semantics=("parallel",),
            # footprint ~few MiB at tb=1024: default scoped VMEM limit is ample
            # on v5e/v6e/v7x, so no explicit vmem_limit_bytes.
        ),
        cost_estimate=cost,
    )(x, w1_c, b1_c, w2_c, b2_c, w3_c, b3_c)

    logits = out_t[0, :].reshape(B, 1)   # contiguous row read (lane-dense)
    preds = out_t[1, :].reshape(B, 1)
    return {"logits": logits, "preds": preds}


def ffnn_reference(x, w1, b1, w2, b2, w3, b3):
    h1 = jnp.maximum(x @ w1 + b1, 0.0)
    h2 = jnp.maximum(h1 @ w2 + b2, 0.0)
    return h2 @ w3 + b3


if __name__ == "__main__":
    # small shapes consistent with the module's MLP structure
    batch = 200            # not a multiple of 128 -> exercises masked ragged tile
    feat_dim = 128         # args.feat_dim
    feat_embed_dim = 128   # args.feat_embed_dim
    class_embed_dim = 64   # args.class_embed_dim
    output_dim = 1         # layer2 -> 1

    key = jax.random.PRNGKey(0)
    kx, k1, k2, k3, kb1, kb2, kb3 = jax.random.split(key, 7)

    x = jax.random.normal(kx, (batch, feat_dim), dtype=jnp.float32)

    # deterministic "Kaiming-uniform-like" init, weights stored as (in, out)
    def init_w(k, fan_in, fan_out):
        bound = 1.0 / (fan_in ** 0.5)
        return jax.random.uniform(k, (fan_in, fan_out), jnp.float32, -bound, bound)

    def init_b(k, fan_in, fan_out):
        bound = 1.0 / (fan_in ** 0.5)
        return jax.random.uniform(k, (fan_out,), jnp.float32, -bound, bound)

    w1 = init_w(k1, feat_dim, feat_embed_dim)
    b1 = init_b(kb1, feat_dim, feat_embed_dim)
    w2 = init_w(k2, feat_embed_dim, class_embed_dim)
    b2 = init_b(kb2, feat_embed_dim, class_embed_dim)
    w3 = init_w(k3, class_embed_dim, output_dim)
    b3 = init_b(kb3, class_embed_dim, output_dim)

    ref_logits = ffnn_reference(x, w1, b1, w2, b2, w3, b3)
    ref_preds = jax.nn.sigmoid(ref_logits)

    # fp32 path: tight check
    out32 = ffnn_forward(x, w1, b1, w2, b2, w3, b3, compute_dtype=jnp.float32)
    logits32 = jax.block_until_ready(out32["logits"])
    assert logits32.shape == (batch, output_dim)
    assert jnp.allclose(logits32, ref_logits, atol=1e-5, rtol=1e-5), "fp32 logits mismatch"
    assert jnp.allclose(out32["preds"], ref_preds, atol=1e-5, rtol=1e-5), "fp32 preds mismatch"

    # bf16 path (default, fast MXU path on v6e/v7x): loosened tolerance
    out16 = ffnn_forward(x, w1, b1, w2, b2, w3, b3, compute_dtype=jnp.bfloat16)
    logits16 = jax.block_until_ready(out16["logits"])
    assert logits16.shape == (batch, output_dim)
    assert jnp.allclose(logits16, ref_logits, atol=5e-2, rtol=5e-2), "bf16 logits mismatch"
    assert jnp.allclose(out16["preds"], ref_preds, atol=5e-2, rtol=5e-2), "bf16 preds mismatch"

    print("KERNEL_OK")
</pallas_src>

<mosaic_0001>
module attributes {stable_mosaic.version = 11 : i64} {
  func.func @ffnn_kernel(%arg0: i32, %arg1: memref<128x128xf32, #tpu.memory_space<vmem>>, %arg2: memref<128x128xf32, #tpu.memory_space<vmem>>, %arg3: memref<1x128xf32, #tpu.memory_space<vmem>>, %arg4: memref<128x64xf32, #tpu.memory_space<vmem>>, %arg5: memref<1x64xf32, #tpu.memory_space<vmem>>, %arg6: memref<8x64xf32, #tpu.memory_space<vmem>>, %arg7: memref<8x1xf32, #tpu.memory_space<vmem>>, %arg8: memref<8x128xf32, #tpu.memory_space<vmem>>) attributes {dimension_semantics = [#tpu.dimension_semantics<parallel>], iteration_bounds = array<i64: 2>, scalar_prefetch = 0 : i64, scratch_operands = 0 : i64, tpu.core_type = #tpu.core_type<tc>, window_params = [{transform_indices = @transform_0, window_bounds = array<i64: 128, 128>}, {pipeline_mode = #tpu.pipeline_mode<synchronous>, transform_indices = @transform_1, window_bounds = array<i64: 128, 128>}, {pipeline_mode = #tpu.pipeline_mode<synchronous>, transform_indices = @transform_2, window_bounds = array<i64: 1, 128>}, {pipeline_mode = #tpu.pipeline_mode<synchronous>, transform_indices = @transform_3, window_bounds = array<i64: 128, 64>}, {pipeline_mode = #tpu.pipeline_mode<synchronous>, transform_indices = @transform_4, window_bounds = array<i64: 1, 64>}, {pipeline_mode = #tpu.pipeline_mode<synchronous>, transform_indices = @transform_5, window_bounds = array<i64: 8, 64>}, {pipeline_mode = #tpu.pipeline_mode<synchronous>, transform_indices = @transform_6, window_bounds = array<i64: 8, 1>}, {transform_indices = @transform_7, window_bounds = array<i64: 8, 128>}]} {
    %c0 = arith.constant 0 : index
    %c0_0 = arith.constant 0 : index
    %0 = vector.load %arg1[%c0, %c0_0] : memref<128x128xf32, #tpu.memory_space<vmem>>, vector<128x128xf32>
    %c0_1 = arith.constant 0 : index
    %c0_2 = arith.constant 0 : index
    %1 = vector.load %arg2[%c0_1, %c0_2] : memref<128x128xf32, #tpu.memory_space<vmem>>, vector<128x128xf32>
    %cst = arith.constant dense<0.000000e+00> : vector<128x128xf32>
    %2 = tpu.matmul %0, %1, %cst {dimension_numbers = #tpu.dot_dimension_numbers<[1], [0], [0], [1], [0, 0, 1, 1], [], []>} : vector<128x128xf32>, vector<128x128xf32>, vector<128x128xf32> -> vector<128x128xf32>
    %c0_3 = arith.constant 0 : index
    %c0_4 = arith.constant 0 : index
    %3 = vector.load %arg3[%c0_3, %c0_4] : memref<1x128xf32, #tpu.memory_space<vmem>>, vector<1x128xf32>
    %4 = vector.broadcast %3 : vector<1x128xf32> to vector<128x128xf32>
    %5 = arith.addf %2, %4 : vector<128x128xf32>
    %cst_5 = arith.constant 0.000000e+00 : f32
    %6 = vector.broadcast %cst_5 : f32 to vector<128x128xf32>
    %7 = arith.maximumf %5, %6 : vector<128x128xf32>
    %c0_6 = arith.constant 0 : index
    %c0_7 = arith.constant 0 : index
    %8 = vector.load %arg4[%c0_6, %c0_7] : memref<128x64xf32, #tpu.memory_space<vmem>>, vector<128x64xf32>
    %cst_8 = arith.constant dense<0.000000e+00> : vector<128x64xf32>
    %9 = tpu.matmul %7, %8, %cst_8 {dimension_numbers = #tpu.dot_dimension_numbers<[1], [0], [0], [1], [0, 0, 1, 1], [], []>} : vector<128x128xf32>, vector<128x64xf32>, vector<128x64xf32> -> vector<128x64xf32>
    %c0_9 = arith.constant 0 : index
    %c0_10 = arith.constant 0 : index
    %10 = vector.load %arg5[%c0_9, %c0_10] : memref<1x64xf32, #tpu.memory_space<vmem>>, vector<1x64xf32>
    %11 = vector.broadcast %10 : vector<1x64xf32> to vector<128x64xf32>
    %12 = arith.addf %9, %11 : vector<128x64xf32>
    %cst_11 = arith.constant 0.000000e+00 : f32
    %13 = vector.broadcast %cst_11 : f32 to vector<128x64xf32>
    %14 = arith.maximumf %12, %13 : vector<128x64xf32>
    %c0_12 = arith.constant 0 : index
    %c0_13 = arith.constant 0 : index
    %15 = vector.load %arg6[%c0_12, %c0_13] : memref<8x64xf32, #tpu.memory_space<vmem>>, vector<8x64xf32>
    %cst_14 = arith.constant dense<0.000000e+00> : vector<8x128xf32>
    %16 = tpu.matmul %15, %14, %cst_14 {dimension_numbers = #tpu.dot_dimension_numbers<[1], [1], [0], [0], [0, 0, 1, 0], [], []>} : vector<8x64xf32>, vector<128x64xf32>, vector<8x128xf32> -> vector<8x128xf32>
    %c0_15 = arith.constant 0 : index
    %c0_16 = arith.constant 0 : index
    %17 = vector.load %arg7[%c0_15, %c0_16] : memref<8x1xf32, #tpu.memory_space<vmem>>, vector<8x1xf32>
    %18 = vector.broadcast %17 : vector<8x1xf32> to vector<8x128xf32>
    %19 = arith.addf %16, %18 : vector<8x128xf32>
    %20 = tpu.iota {dimensions = array<i32: 0>} : vector<8x128xi32>
    %c1_i32 = arith.constant 1 : i32
    %21 = vector.broadcast %c1_i32 : i32 to vector<8x128xi32>
    %22 = arith.cmpi eq, %20, %21 : vector<8x128xi32>
    %23 = arith.negf %19 : vector<8x128xf32>
    %24 = math.exp %23 : vector<8x128xf32>
    %cst_17 = arith.constant 1.000000e+00 : f32
    %25 = vector.broadcast %cst_17 : f32 to vector<8x128xf32>
    %26 = arith.addf %25, %24 : vector<8x128xf32>
    %27 = arith.divf %25, %26 : vector<8x128xf32>
    %28 = arith.select %22, %27, %19 : vector<8x128xi1>, vector<8x128xf32>
    %c0_18 = arith.constant 0 : index
    %c0_19 = arith.constant 0 : index
    %29 = vector.load %arg8[%c0_18, %c0_19] : memref<8x128xf32, #tpu.memory_space<vmem>>, vector<8x128xf32>
    tpu.vector_store %arg8[%c0_18, %c0_19], %28 {strides = array<i32>} : memref<8x128xf32, #tpu.memory_space<vmem>>, vector<8x128xf32>,
    return
  }
  func.func @transform_0(%arg0: i32) -> (i32, i32) {
    %c0_i32 = arith.constant 0 : i32
    %c0_i32_0 = arith.constant 0 : i32
    return %arg0, %c0_i32 : i32, i32
  }
  func.func @transform_1(%arg0: i32) -> (i32, i32) {
    %c0_i32 = arith.constant 0 : i32
    %c0_i32_0 = arith.constant 0 : i32
    %c0_i32_1 = arith.constant 0 : i32
    return %c0_i32, %c0_i32_0 : i32, i32
  }
  func.func @transform_2(%arg0: i32) -> (i32, i32) {
    %c0_i32 = arith.constant 0 : i32
    %c0_i32_0 = arith.constant 0 : i32
    %c0_i32_1 = arith.constant 0 : i32
    return %c0_i32, %c0_i32_0 : i32, i32
  }
  func.func @transform_3(%arg0: i32) -> (i32, i32) {
    %c0_i32 = arith.constant 0 : i32
    %c0_i32_0 = arith.constant 0 : i32
    %c0_i32_1 = arith.constant 0 : i32
    return %c0_i32, %c0_i32_0 : i32, i32
  }
  func.func @transform_4(%arg0: i32) -> (i32, i32) {
    %c0_i32 = arith.constant 0 : i32
    %c0_i32_0 = arith.constant 0 : i32
    %c0_i32_1 = arith.constant 0 : i32
    return %c0_i32, %c0_i32_0 : i32, i32
  }
  func.func @transform_5(%arg0: i32) -> (i32, i32) {
    %c0_i32 = arith.constant 0 : i32
    %c0_i32_0 = arith.constant 0 : i32
    %c0_i32_1 = arith.constant 0 : i32
    return %c0_i32, %c0_i32_0 : i32, i32
  }
  func.func @transform_6(%arg0: i32) -> (i32, i32) {
    %c0_i32 = arith.constant 0 : i32
    %c0_i32_0 = arith.constant 0 : i32
    %c0_i32_1 = arith.constant 0 : i32
    return %c0_i32, %c0_i32_0 : i32, i32
  }
  func.func @transform_7(%arg0: i32) -> (i32, i32) {
    %c0_i32 = arith.constant 0 : i32
    %c0_i32_0 = arith.constant 0 : i32
    return %c0_i32, %arg0 : i32, i32
  }
}

</mosaic_0001>

<bundles_post_ra>
// kernel: tpu_custom_call.1
= control target key start
LH: loop header
LB: loop body
LE: loop exit
PB: predicated region body
PF: predicated region fallthrough
CT: control target
= control target key end

     0   :  { %12 = vsyncpa [#allocation3], 0  ;;  %s1325_s0 = inlined_call_operand.vmem [shape: f32[200,128], index: 0, kind: input, shape index: {}]   ;;  %s1326_s1 = inlined_call_operand.hbm [shape: f32[128,128], index: 1, kind: input, shape index: {}]   ;;  %s1327_s2 = inlined_call_operand.hbm [shape: f32[1,128], index: 2, kind: input, shape index: {}]   ;;  %s1328_s3 = inlined_call_operand.vmem [shape: f32[128,64], index: 3, kind: input, shape index: {}]   ;;  %s1329_s4 = inlined_call_operand.vmem [shape: f32[1,64], index: 4, kind: input, shape index: {}]   ;;  %s1330_s5 = inlined_call_operand.hbm [shape: f32[8,64], index: 5, kind: input, shape index: {}]   ;;  %s1331_s6 = inlined_call_operand.vmem [shape: f32[8,1], index: 6, kind: input, shape index: {}]   ;;  %s1332_s7 = inlined_call_operand.hbm [shape: f32[8,200], index: 7, kind: output, shape index: {}]  }
   0x1   :  { %13 = vsyncpa [#allocation6], 0 }
   0x2   :  { %14 = vsyncpa [#allocation4], 0 }
   0x3   :  { %16 = vsyncpa [#allocation4 + $0x1], 0  ;;  %s1111_s24 = smov 0   ;;  %s1113_s25 = smov 0  }
   0x4   :  { %s1115_s26 = smov 0   ;;  %s1117_s27 = smov 0  }
   0x5 LB: > { %s1132_s28 = sadd.s32 4294967295, %s1063_s27   ;;  %s772_s29 = sadd.s32 4294967294, %s1063_s27   ;;  %s1063_s27 = sphi %s1117_s27, %s1340_s27   ;;  %s1059_s26 = sphi %s1115_s26, %s1339_s26   ;;  %s1055_s25 = sphi %s1113_s25, %s1338_s25   ;;  %s1051_s24 = sphi %s1111_s24, %s1337_s24  }
   0x6   : > { %s1136_s30 = sadd.s32 1, %s1063_s27   ;;  %s181_s8 = sadd.s32 1, %s1059_s26 }
   0x7   : > { %s178_s9 = ssub.s32 %s1063_s27, %s1136_s30  ;;  %p191_p0 = scmp.ne.s32.totalorder %s1059_s26, %s1055_s25 }
   0x8   : > { %p179_p1 = scmp.eq.s32.totalorder %s178_s9, 0  ;;  %p192_p2 = scmp.eq.s32.totalorder %s1132_s28, 1 }
   0x9   : > { %p197_p3 = scmp.ne.s32.totalorder %s1055_s25, %s1051_s24  ;;  %p198_p4 = scmp.eq.s32.totalorder %s772_s29, 1 }
   0xa   : > { %s1147_s10 = scalar_select %p179_p1, %s1059_s26, %s181_s8  }
   0xb   : > { %p1149_p5 = por %p192_p2, %p191_p0  ;;  %p1153_p6 = por %p198_p4, %p197_p3 }
   0xc   : > { %p773_p7 = scmp.ge.s32.totalorder %s1063_s27, 1  ;;  %p205_p8 = scmp.lt.s32.totalorder %s1063_s27, 3 }
   0xd   : > { %p851_p9 = scmp.eq.s32.totalorder %s1132_s28, 0  ;;  %s231_s16 = sshll.u32 %s1327_s2, 4  ;;  %s232_s16 = int_to_ptr.hbm [resolvable:$true] %s231_s16 }
   0xe   : > { %p1160_p10 = pnand %p773_p7, %p205_p8  ;;  %s1065_s17 = smov [#allocation5]  }
   0xf   : > { %s233_s18 = sshll.u32 %s1065_s17, 4  ;;  %s216_s21 = sshll.u32 %s1326_s1, 4  ;;  %s234_s18 = int_to_ptr.vmem [resolvable:$true] %s233_s18  ;;  %s217_s21 = int_to_ptr.hbm [resolvable:$true] %s216_s21 }
  0x10   : > { %p837_p11 = pneg %p1160_p10  ;;  %s1066_s23 = smov [#allocation2]  }
  0x11   : > { %s218_s29 = sshll.u32 %s1066_s23, 4  ;;  %s1067_s8 = smov 128   ;;  %s219_s29 = int_to_ptr.vmem [resolvable:$true] %s218_s29 }
  0x12   : > { %p1174_p12 = pnand %p851_p9, %p837_p11  ;;  %s1068_s9 = smov 8  }
  0x13   : > { %s249_s17 = sshll.u32 %s1330_s5, 4  ;;  %s1069_s19 = smov [#allocation7]   ;;  %s250_s17 = int_to_ptr.hbm [resolvable:$true] %s249_s17 }
  0x14   : > { %843 = dma.hbm_to_vmem [thread:$0]  (!%p1174_p12), %s232_s16, 16, %s234_s18, [#allocation6]  }
  0x15   : > { %840 = dma.hbm_to_vmem [thread:$0]  (!%p1174_p12), %s217_s21, 2048, %s219_s29, [#allocation3], %s1067_s8, %s1067_s8, %s1068_s9  }
  0x16   : > { %s251_s20 = sshll.u32 %s1069_s19, 4  ;;  %284 = sbr.rel (%p1160_p10) target bundleno = 671 (0x29f), region = 48  ;;  %s252_s20 = int_to_ptr.vmem [resolvable:$true] %s251_s20 }
  0x17   : > { %846 = dma.hbm_to_vmem [thread:$0]  (!%p1174_p12), %s250_s17, 128, %s252_s20, [#allocation6]  }
  0x1b   : > { %1038 = dma.done.wait (%p851_p9), [#allocation3], 2048  }
  0x1c   : > { %1040 = vsyncadd (%p851_p9), [#allocation3], 4294965248 }
  0x1d   : > { %1042 = dma.done.wait (%p851_p9), [#allocation6], 144  }
  0x1e   : > { %1044 = vsyncadd (%p851_p9), [#allocation6], 4294967152  ;;  %v376_v0 = vld [vmem:[#allocation2 + $0x78] sm:$0xff]  ;;  %v375_v1 = vld [vmem:[#allocation2 + $0x70] sm:$0xff]  ;;  %s783_s13 = sshll.u32 %s1132_s28, 4  ;;  %vm570_vm0 = vcmask 523264  }
  0x1f   : > { %381 = vmatpush.msra.mxu0 %v376_v0  ;;  %807 = vmatpush.msra.mxu3 %v376_v0  ;;  %v374_v2 = vld [vmem:[#allocation2 + $0x68] sm:$0xff]  ;;  %v373_v3 = vld [vmem:[#allocation2 + $0x60] sm:$0xff]  ;;  %v372_v4 = vld [vmem:[#allocation2 + $0x58] sm:$0xff]  ;;  %p336_p13 = scmp.lt.s32.totalorder %s783_s13, 24  ;;  %s804_s18 = sshll.u32 %s1132_s28, 3 }
  0x20   : > { %v371_v5 = vld [vmem:[#allocation2 + $0x50] sm:$0xff]  ;;  %v370_v6 = vld [vmem:[#allocation2 + $0x48] sm:$0xff]  ;;  %v369_v7 = vld [vmem:[#allocation2 + $0x40] sm:$0xff]  ;;  %s677_s29 = scalar_lea.hbm %s1332_s7, %s804_s18  ;;  %s1013_s20 = scalar_lea.hbm %s1332_s7, 16 }
  0x21   : > { %382 = vmatpush.msra.mxu0 %v375_v1  ;;  %808 = vmatpush.msra.mxu3 %v375_v1  ;;  %v368_v8 = vld [vmem:[#allocation2 + $0x38] sm:$0xff]  ;;  %v367_v9 = vld [vmem:[#allocation2 + $0x30] sm:$0xff]  ;;  %v366_v10 = vld [vmem:[#allocation2 + $0x28] sm:$0xff]  ;;  %s1342_s13 = smov (!%p336_p13, %s783_s13), 24  ;;  %s681_s14 = sshll.u32 %s677_s29, 4  ;;  %s682_s14 = int_to_ptr.hbm [resolvable:$true] %s681_s14 }
  0x22   : > { %v365_v11 = vld [vmem:[#allocation2 + $0x20] sm:$0xff]  ;;  %v364_v12 = vld [vmem:[#allocation2 + $0x18] sm:$0xff]  ;;  %s784_s16 = sshll.u32 %s1342_s13, 3  ;;  %v363_v13 = vld [vmem:[#allocation2 + $0x10] sm:$0xff]  ;;  %s328_s13 = sand.u32 1, %s1055_s25  }
  0x23   : > { %383 = vmatpush.msra.mxu0 %v374_v2  ;;  %809 = vmatpush.msra.mxu3 %v374_v2  ;;  %v362_v14 = vld [vmem:[#allocation2 + $0x8] sm:$0xff]  ;;  %s1201_s22 = scalar_lea.vmem %s1325_s0, %s784_s16  ;;  %v361_v15 = vld [vmem:[#allocation2] sm:$0xff]  ;;  %v477_v23 = vld [vmem:[%s1328_s3 + $0x78] sm:$0xff]  ;;  %s782_s16 = sshll.u32 %s328_s13, 3 }
  0x24   : > { %v345_v16 = vld [vmem:[%s1201_s22] sm:$0xff]  ;;  %v346_v17 = vld [vmem:[%s1201_s22 + $0x8] sm:$0xff]  ;;  %v347_v18 = vld [vmem:[%s1201_s22 + $0x10] sm:$0xff]  ;;  %482 = vmatpush.msra.mxu1 %v477_v23  ;;  %s330_s8 = scalar_lea.vmem [#allocation8], %s782_s16  ;;  %s667_s28 = scalar_lea.sflag [#allocation4], %s328_s13 }
  0x25   : > { %384 = vmatpush.msra.mxu0 %v373_v3  ;;  %810 = vmatpush.msra.mxu3 %v373_v3  ;;  %v348_v19 = vld [vmem:[%s1201_s22 + $0x18] sm:$0xff]  ;;  %v349_v20 = vld [vmem:[%s1201_s22 + $0x20] sm:$0xff]  ;;  %v350_v21 = vld [vmem:[%s1201_s22 + $0x28] sm:$0xff]  ;;  %s679_s9 = sshll.u32 %s330_s8, 4  ;;  %s1007_s15 = sshra.s32 %s682_s14, 4  ;;  %s680_s9 = int_to_ptr.vmem [resolvable:$true] %s679_s9  ;;  %s1008_s15 = int_to_ptr.hbm [resolvable:$true] %s1007_s15 }
  0x26   : > { %v355_v22 = vld [vmem:[%s1201_s22 + $0x50] sm:$0xff]  ;;  %v475_v25 = vld [vmem:[%s1328_s3 + $0x68] sm:$0xff]  ;;  %v474_v27 = vld [vmem:[%s1328_s3 + $0x60] sm:$0xff]  ;;  %p1014_p3 = scmp.lt.s32.totalorder %s1008_s15, %s1332_s7 }
  0x27   : > { %385 = vmatpush.msra.mxu0 %v372_v4  ;;  %811 = vmatpush.msra.mxu3 %v372_v4  ;;  %v476_v24 = vld [vmem:[%s1328_s3 + $0x70] sm:$0xff]  ;;  %v356_v28 = vld [vmem:[%s1201_s22 + $0x58] sm:$0xff]  ;;  %v471_v31 = vld [vmem:[%s1328_s3 + $0x48] sm:$0xff] }
  0x28   : > { %483 = vmatpush.msra.mxu1 %v476_v24  ;;  %v351_v26 = vld [vmem:[%s1201_s22 + $0x30] sm:$0xff]  ;;  %v473_v29 = vld [vmem:[%s1328_s3 + $0x58] sm:$0xff]  ;;  %v470_v33 = vld [vmem:[%s1328_s3 + $0x40] sm:$0xff] }
  0x29   : > { %386 = vmatpush.msra.mxu0 %v371_v5  ;;  %812 = vmatpush.msra.mxu3 %v371_v5  ;;  %v472_v30 = vld [vmem:[%s1328_s3 + $0x50] sm:$0xff]  ;;  %v352_v32 = vld [vmem:[%s1201_s22 + $0x38] sm:$0xff]  ;;  %v357_v34 = vld [vmem:[%s1201_s22 + $0x60] sm:$0xff] }
  0x2a   : > { %484 = vmatpush.msra.mxu1 %v475_v25  ;;  %v469_v35 = vld [vmem:[%s1328_s3 + $0x38] sm:$0xff]  ;;  %v468_v36 = vld [vmem:[%s1328_s3 + $0x30] sm:$0xff]  ;;  %v467_v37 = vld [vmem:[%s1328_s3 + $0x28] sm:$0xff] }
  0x2b   : > { %387 = vmatpush.msra.mxu0 %v370_v6  ;;  %813 = vmatpush.msra.mxu3 %v370_v6  ;;  %v353_v38 = vld [vmem:[%s1201_s22 + $0x40] sm:$0xff]  ;;  %v358_v40 = vld [vmem:[%s1201_s22 + $0x68] sm:$0xff]  ;;  %v465_v41 = vld [vmem:[%s1328_s3 + $0x18] sm:$0xff] }
  0x2c   : > { %485 = vmatpush.msra.mxu1 %v474_v27  ;;  %v466_v39 = vld [vmem:[%s1328_s3 + $0x20] sm:$0xff]  ;;  %v354_v42 = vld [vmem:[%s1201_s22 + $0x48] sm:$0xff]  ;;  %v359_v43 = vld [vmem:[%s1201_s22 + $0x70] sm:$0xff] }
  0x2d   : > { %388 = vmatpush.msra.mxu0 %v369_v7  ;;  %814 = vmatpush.msra.mxu3 %v369_v7  ;;  %v360_v44 = vld [vmem:[%s1201_s22 + $0x78] sm:$0xff]  ;;  %v464_v45 = vld [vmem:[%s1328_s3 + $0x10] sm:$0xff]  ;;  %v463_v46 = vld [vmem:[%s1328_s3 + $0x8] sm:$0xff]  ;;  %s1009_s22 = scalar_lea.hbm %s1008_s15, 8 }
  0x2e   : > { %486 = vmatpush.msra.mxu1 %v473_v29  ;;  %v462_v47 = vld [vmem:[%s1328_s3] sm:$0xff]  ;;  %p1010_p0 = scmp.ne.s32.totalorder %s1008_s15, %s1009_s22  ;;  %p1015_p4 = scmp.lt.s32.totalorder %s1013_s20, %s1009_s22 }
  0x2f   : > { %389 = vmatpush.msra.mxu0 %v368_v8  ;;  %815 = vmatpush.msra.mxu3 %v368_v8  ;;  %v897_v48 = vld [vmem:[#allocation5] ss:$0 sm:$0xff] }
  0x30   : > { %487 = vmatpush.msra.mxu1 %v472_v30  ;;  %p1011_p1 = pnand %p1010_p0, %p1149_p5  ;;  %p1016_p7 = por %p1015_p4, %p1014_p3 }
  0x31   : > { %390 = vmatpush.msra.mxu0 %v367_v9  ;;  %816 = vmatpush.msra.mxu3 %v367_v9 }
  0x32   : > { %488 = vmatpush.msra.mxu1 %v471_v31  ;;  %p1012_p2 = pneg %p1011_p1 }
  0x33   : > { %391 = vmatpush.msra.mxu0 %v366_v10  ;;  %817 = vmatpush.msra.mxu3 %v366_v10 }
  0x34   : > { %489 = vmatpush.msra.mxu1 %v470_v33  ;;  %p1017_p8 = pnand %p1016_p7, %p1012_p2 }
  0x35   : > { %392 = vmatpush.msra.mxu0 %v365_v11  ;;  %818 = vmatpush.msra.mxu3 %v365_v11 }
  0x36   : > { %490 = vmatpush.msra.mxu1 %v469_v35 }
  0x37   : > { %393 = vmatpush.msra.mxu0 %v364_v12  ;;  %819 = vmatpush.msra.mxu3 %v364_v12 }
  0x38   : > { %491 = vmatpush.msra.mxu1 %v468_v36 }
  0x39   : > { %394 = vmatpush.msra.mxu0 %v363_v13  ;;  %820 = vmatpush.msra.mxu3 %v363_v13 }
  0x3a   : > { %492 = vmatpush.msra.mxu1 %v467_v37 }
  0x3b   : > { %395 = vmatpush.msra.mxu0 %v362_v14  ;;  %821 = vmatpush.msra.mxu3 %v362_v14 }
  0x3c   : > { %493 = vmatpush.msra.mxu1 %v466_v39 }
  0x3d   : > { %396 = vmatpush.msra.mxu0 %v361_v15  ;;  %822 = vmatpush.msra.mxu3 %v361_v15 }
  0x3e   : > { %397 = vmatmul.f32.vlgmr.msra.gmra.mxu0 %v345_v16  ;;  %427 = vmatmul.f32.vlgmr.msra.gmra.mxu3 %v355_v22 }
  0x3f   : > { %494 = vmatpush.msra.mxu1 %v465_v41 }
  0x41   : > { %495 = vmatpush.msra.mxu1 %v464_v45 }
  0x43   : > { %496 = vmatpush.msra.mxu1 %v463_v46 }
  0x45   : > { %497 = vmatpush.msra.mxu1 %v462_v47 }
  0x46   : > { %400 = vmatmul.f32.gmra.mxu0 %v346_v17  ;;  %430 = vmatmul.f32.gmra.mxu3 %v356_v28 }
  0x4e   : > { %403 = vmatmul.f32.gmra.mxu0 %v347_v18  ;;  %433 = vmatmul.f32.gmra.mxu3 %v357_v34 }
  0x56   : > { %406 = vmatmul.f32.gmra.mxu0 %v348_v19  ;;  %436 = vmatmul.f32.gmra.mxu3 %v358_v40 }
  0x5e   : > { %409 = vmatmul.f32.gmra.mxu0 %v349_v20  ;;  %439 = vmatmul.f32.gmra.mxu3 %v359_v43 }
  0x66   : > { %412 = vmatmul.f32.gmra.mxu0 %v350_v21  ;;  %442 = vmatmul.f32.gmra.mxu3 %v360_v44 }
  0x6e   : > { %415 = vmatmul.f32.gmra.mxu0 %v351_v26 }
  0x76   : > { %418 = vmatmul.f32.gmra.mxu0 %v352_v32 }
  0x7e   : > { %421 = vmatmul.f32.gmra.mxu0 %v353_v38 }
  0x86   : > { %424 = vmatmul.f32.gmra.mxu0 %v354_v42 }
  0xbb   : > { %v398_v49 = vpop.f32.mrf.mxu0 }
  0xbc   : > { %v399_v50 = vadd.f32 %v897_v48, %v398_v49 }
  0xbe   : > { %v446_v51 = vmax.f32 %v399_v50, 0.0 }
  0xc0   : > { %498 = vmatmul.f32.vlgmr.msra.gmra.mxu1 %v446_v51 }
  0xc1   : > { %v428_v10 = vpop.f32.mrf.mxu3 }
  0xc2   : > { %v429_v17 = vadd.f32 %v897_v48, %v428_v10 }
  0xc3   : > { %v401_v52 = vpop.f32.mrf.mxu0 }
  0xc4   : > { %v402_v53 = vadd.f32 %v897_v48, %v401_v52  ;;  %v456_v18 = vmax.f32 %v429_v17, 0.0 }
  0xc6   : > { %v447_v54 = vmax.f32 %v402_v53, 0.0 }
  0xc8   : > { %501 = vmatmul.f32.gmra.mxu1 %v447_v54 }
  0xc9   : > { %v431_v15 = vpop.f32.mrf.mxu3 }
  0xca   : > { %v432_v20 = vadd.f32 %v897_v48, %v431_v15 }
  0xcb   : > { %v404_v55 = vpop.f32.mrf.mxu0 }
  0xcc   : > { %v405_v56 = vadd.f32 %v897_v48, %v404_v55  ;;  %v457_v21 = vmax.f32 %v432_v20, 0.0  ;;  %v563_v20 = vld [vmem:[#allocation7] sm:$0xff] }
  0xce   : > { %v448_v57 = vmax.f32 %v405_v56, 0.0 }
  0xd0   : > { %504 = vmatmul.f32.gmra.mxu1 %v448_v57 }
  0xd1   : > { %v434_v19 = vpop.f32.mrf.mxu3 }
  0xd2   : > { %v435_v22 = vadd.f32 %v897_v48, %v434_v19 }
  0xd3   : > { %v407_v58 = vpop.f32.mrf.mxu0 }
  0xd4   : > { %v408_v59 = vadd.f32 %v897_v48, %v407_v58  ;;  %v458_v24 = vmax.f32 %v435_v22, 0.0 }
  0xd6   : > { %v449_v60 = vmax.f32 %v408_v59, 0.0 }
  0xd8   : > { %507 = vmatmul.f32.gmra.mxu1 %v449_v60 }
  0xd9   : > { %v437_v23 = vpop.f32.mrf.mxu3 }
  0xda   : > { %v438_v25 = vadd.f32 %v897_v48, %v437_v23 }
  0xdb   : > { %v410_v61 = vpop.f32.mrf.mxu0 }
  0xdc   : > { %v411_v62 = vadd.f32 %v897_v48, %v410_v61  ;;  %v459_v27 = vmax.f32 %v438_v25, 0.0 }
  0xde   : > { %v450_v63 = vmax.f32 %v411_v62, 0.0 }
  0xe0   : > { %510 = vmatmul.f32.gmra.mxu1 %v450_v63 }
  0xe1   : > { %v440_v26 = vpop.f32.mrf.mxu3 }
  0xe2   : > { %v441_v28 = vadd.f32 %v897_v48, %v440_v26 }
  0xe3   : > { %v413_v0 = vpop.f32.mrf.mxu0 }
  0xe4   : > { %v414_v1 = vadd.f32 %v897_v48, %v413_v0  ;;  %v460_v29 = vmax.f32 %v441_v28, 0.0  ;;  %v642_v28 = vlaneseq }
  0xe6   : > { %v451_v2 = vmax.f32 %v414_v1, 0.0 }
  0xe8   : > { %513 = vmatmul.f32.gmra.mxu1 %v451_v2 }
  0xe9   : > { %v443_v30 = vpop.f32.mrf.mxu3 }
  0xea   : > { %v444_v31 = vadd.f32 %v897_v48, %v443_v30 }
  0xeb   : > { %v416_v3 = vpop.f32.mrf.mxu0 }
  0xec   : > { %v417_v4 = vadd.f32 %v897_v48, %v416_v3  ;;  %v461_v32 = vmax.f32 %v444_v31, 0.0  ;;  %v643_v31 = vshrl.u32 %v642_v28, 7 }
  0xee   : > { %v452_v5 = vmax.f32 %v417_v4, 0.0  ;;  %vm644_vm3 = vcmp.eq.s32.totalorder %v643_v31, 1 }
  0xf0   : > { %516 = vmatmul.f32.gmra.mxu1 %v452_v5  ;;  %v564_v5 = vld [vmem:[%s1331_s6] sm:$0xff] }
  0xf3   : > { %v419_v6 = vpop.f32.mrf.mxu0 }
  0xf4   : > { %v420_v7 = vadd.f32 %v897_v48, %v419_v6  ;;  %v1070_v6 = vmov 0  }
  0xf5   : > { %896 = vset.pattern.permute.xlu0 %v1070_v6 }
  0xf6   : > { %v453_v8 = vmax.f32 %v420_v7, 0.0  ;;  %567 = vperm.xlu0 %896, %v564_v5  }
  0xf8   : > { %519 = vmatmul.f32.gmra.mxu1 %v453_v8 }
  0xfb   : > { %v422_v9 = vpop.f32.mrf.mxu0 }
  0xfc   : > { %v423_v11 = vadd.f32 %v897_v48, %v422_v9 }
  0xfe   : > { %v454_v12 = vmax.f32 %v423_v11, 0.0 }
 0x100   : > { %522 = vmatmul.f32.gmra.mxu1 %v454_v12 }
 0x103   : > { %v425_v13 = vpop.f32.mrf.mxu0 }
 0x104   : > { %v426_v14 = vadd.f32 %v897_v48, %v425_v13  ;;  %v898_v48 = vld [vmem:[%s1329_s4] ss:$0 sm:$0xff] }
 0x106   : > { %v455_v16 = vmax.f32 %v426_v14, 0.0 }
 0x108   : > { %525 = vmatmul.f32.gmra.mxu1 %v455_v16 }
 0x110   : > { %528 = vmatmul.f32.gmra.mxu1 %v456_v18 }
 0x118   : > { %531 = vmatmul.f32.gmra.mxu1 %v457_v21 }
 0x120   : > { %534 = vmatmul.f32.gmra.mxu1 %v458_v24 }
 0x128   : > { %537 = vmatmul.f32.gmra.mxu1 %v459_v27 }
 0x130   : > { %540 = vmatmul.f32.gmra.mxu1 %v460_v29 }
 0x138   : > { %543 = vmatmul.f32.gmra.mxu1 %v461_v32 }
 0x13d   : > { %v1267_v33 = vpop.f32.mrf.mxu1 }
 0x13e   : > { %v500_v17 = vadd.f32 %v898_v48, %v1267_v33 }
 0x140   : > { %v547_v19 = vmax.f32 %v500_v17, 0.0 }
 0x145   : > { %v502_v34 = vpop.f32.mrf.mxu1 }
 0x146   : > { %v503_v15 = vadd.f32 %v898_v48, %v502_v34 }
 0x148   : > { %v548_v18 = vmax.f32 %v503_v15, 0.0 }
 0x14d   : > { %v505_v35 = vpop.f32.mrf.mxu1 }
 0x14e   : > { %v506_v13 = vadd.f32 %v898_v48, %v505_v35 }
 0x150   : > { %v549_v16 = vmax.f32 %v506_v13, 0.0 }
 0x155   : > { %v508_v36 = vpop.f32.mrf.mxu1 }
 0x156   : > { %v509_v11 = vadd.f32 %v898_v48, %v508_v36 }
 0x158   : > { %v550_v14 = vmax.f32 %v509_v11, 0.0 }
 0x15d   : > { %v511_v37 = vpop.f32.mrf.mxu1 }
 0x15e   : > { %v512_v9 = vadd.f32 %v898_v48, %v511_v37 }
 0x160   : > { %v551_v12 = vmax.f32 %v512_v9, 0.0 }
 0x165   : > { %v514_v38 = vpop.f32.mrf.mxu1 }
 0x166   : > { %v515_v7 = vadd.f32 %v898_v48, %v514_v38 }
 0x168   : > { %v552_v10 = vmax.f32 %v515_v7, 0.0  ;;  %v568_v21 = vpop.permute.xlu0 %567 }
 0x16d   : > { %v517_v39 = vpop.f32.mrf.mxu1 }
 0x16e   : > { %v518_v3 = vadd.f32 %v898_v48, %v517_v39 }
 0x170   : > { %v553_v8 = vmax.f32 %v518_v3, 0.0 }
 0x175   : > { %v520_v40 = vpop.f32.mrf.mxu1 }
 0x176   : > { %v521_v1 = vadd.f32 %v898_v48, %v520_v40 }
 0x178   : > { %v554_v4 = vmax.f32 %v521_v1, 0.0 }
 0x17d   : > { %v523_v41 = vpop.f32.mrf.mxu1 }
 0x17e   : > { %v524_v63 = vadd.f32 %v898_v48, %v523_v41 }
 0x180   : > { %v555_v2 = vmax.f32 %v524_v63, 0.0 }
 0x185   : > { %v526_v42 = vpop.f32.mrf.mxu1 }
 0x186   : > { %v527_v61 = vadd.f32 %v898_v48, %v526_v42 }
 0x188   : > { %v556_v0 = vmax.f32 %v527_v61, 0.0 }
 0x18d   : > { %v529_v43 = vpop.f32.mrf.mxu1 }
 0x18e   : > { %v530_v59 = vadd.f32 %v898_v48, %v529_v43 }
 0x190   : > { %v557_v62 = vmax.f32 %v530_v59, 0.0 }
 0x195   : > { %v532_v44 = vpop.f32.mrf.mxu1 }
 0x196   : > { %v533_v57 = vadd.f32 %v898_v48, %v532_v44 }
 0x198   : > { %v558_v60 = vmax.f32 %v533_v57, 0.0 }
 0x19d   : > { %v535_v45 = vpop.f32.mrf.mxu1 }
 0x19e   : > { %v536_v55 = vadd.f32 %v898_v48, %v535_v45 }
 0x1a0   : > { %v559_v58 = vmax.f32 %v536_v55, 0.0 }
 0x1a5   : > { %v538_v46 = vpop.f32.mrf.mxu1 }
 0x1a6   : > { %v539_v53 = vadd.f32 %v898_v48, %v538_v46 }
 0x1a8   : > { %v560_v56 = vmax.f32 %v539_v53, 0.0 }
 0x1ad   : > { %v541_v47 = vpop.f32.mrf.mxu1 }
 0x1ae   : > { %v542_v51 = vadd.f32 %v898_v48, %v541_v47 }
 0x1b0   : > { %v561_v54 = vmax.f32 %v542_v51, 0.0 }
 0x1b5   : > { %v544_v49 = vpop.f32.mrf.mxu1 }
 0x1b6   : > { %v545_v50 = vadd.f32 %v898_v48, %v544_v49 }
 0x1b8   : > { %v562_v52 = vmax.f32 %v545_v50, 0.0 }
 0x1ba   : > { %785 = vmatpush.xpose.msk.msra.mxu2 %vm570_vm0, %v562_v52 }
 0x1be   : > { %786 = vmatpush.xpose.msk.msra.mxu2 %vm570_vm0, %v561_v54 }
 0x1c2   : > { %787 = vmatpush.xpose.msk.msra.mxu2 %vm570_vm0, %v560_v56 }
 0x1c6   : > { %788 = vmatpush.xpose.msk.msra.mxu2 %vm570_vm0, %v559_v58 }
 0x1ca   : > { %789 = vmatpush.xpose.msk.msra.mxu2 %vm570_vm0, %v558_v60 }
 0x1ce   : > { %790 = vmatpush.xpose.msk.msra.mxu2 %vm570_vm0, %v557_v62 }
 0x1d2   : > { %791 = vmatpush.xpose.msk.msra.mxu2 %vm570_vm0, %v556_v0 }
 0x1d6   : > { %792 = vmatpush.xpose.msk.msra.mxu2 %vm570_vm0, %v555_v2 }
 0x1da   : > { %793 = vmatpush.xpose.msk.msra.mxu2 %vm570_vm0, %v554_v4 }
 0x1de   : > { %794 = vmatpush.xpose.msk.msra.mxu2 %vm570_vm0, %v553_v8 }
 0x1e2   : > { %795 = vmatpush.xpose.msk.msra.mxu2 %vm570_vm0, %v552_v10 }
 0x1e6   : > { %796 = vmatpush.xpose.msk.msra.mxu2 %vm570_vm0, %v551_v12 }
 0x1ea   : > { %797 = vmatpush.xpose.msk.msra.mxu2 %vm570_vm0, %v550_v14 }
 0x1ee   : > { %798 = vmatpush.xpose.msk.msra.mxu2 %vm570_vm0, %v549_v16 }
 0x1f2   : > { %799 = vmatpush.xpose.msk.msra.mxu2 %vm570_vm0, %v548_v18 }
 0x1f6   : > { %800 = vmatpush.xpose.msk.msra.mxu2 %vm570_vm0, %v547_v19 }
 0x1f9   : > { %801 = vmatmul.msk.f32.vlgmr.msra.gmra.mxu2 %vm570_vm0, %v563_v20 }
 0x27c   : > { %v639_v22 = vpop.f32.mrf.mxu2 }
 0x27d   : > { %v640_v23 = vadd.f32 %v639_v22, %v568_v21 }
 0x27f   : > { %v802_v24 = vmul.f32 -1.442695, %v640_v23 }
 0x281   : > { %899 = vpow2.f32 %v802_v24 }
 0x287   : > { %v900_v25 = vpop.eup %899 }
 0x288   : > { %v648_v26 = vadd.f32 1.0, %v900_v25 }
 0x28a   : > { %901 = vrcp.f32 %v648_v26  ;;  %v660_v32 = vand.u32 2147483648, %v648_v26  ;;  %v658_v34 = vand.u32 2147483647, %v648_v26  ;;  %vm654_vm2 = vweird.f32 %v648_v26 }
 0x28c   : > { %v661_v36 = vor.u32 1.1754944e-38, %v660_v32  ;;  %vm659_vm5 = vcmp.eq.f32.partialorder %v658_v34, 8.507059e+37 }
 0x290   : > { %v902_v27 = vpop.eup %901 }
 0x291   : > { %v650_v29 = vmul.f32 %v902_v27, %v648_v26  ;;  %vm655_vm1 = vweird.f32 %v902_v27 }
 0x292   : > { %vm656_vm4 = vmor %vm654_vm2, %vm655_vm1 }
 0x293   : > { %v651_v30 = vsub.f32 1.0, %v650_v29 }
 0x295   : > { %v652_v33 = vmul.f32 %v902_v27, %v651_v30 }
 0x297   : > { %v653_v35 = vadd.f32 %v902_v27, %v652_v33 }
 0x299   : > { %v657_v37 = vsel %vm656_vm4, %v902_v27, %v653_v35 }
 0x29a   : > { %v662_v38 = vsel %vm659_vm5, %v661_v36, %v657_v37 }
 0x29b   : > { %v664_v39 = vsel %vm644_vm3, %v662_v38, %v640_v23 }
 0x29c   : > { %665 = vst [vmem:[%s330_s8] sm:$0xff] %v664_v39 }
 0x29d   : > { %1020 = shalt.err (!%p1017_p8)
}
 0x29e   : > { %835 = dma.vmem_to_hbm [thread:$0]  (%p1149_p5), %s680_s9, 128, %s682_s14, %s667_s28  }
 0x29f PF: > { %p857_p9 = scmp.ge.s32.totalorder %s1063_s27, 2  ;;  %s693_s13 = sand.u32 1, %s1051_s24  }
 0x2a0   : > { %s694_s21 = scalar_lea.sflag [#allocation4], %s693_s13 }
 0x2a1   : > { %p848_p10 = pnand %p857_p9, %p1153_p6 }
 0x2a3   : > { %p849_p11 = pneg %p848_p10 }
 0x2a5   : > { %1046 = dma.done.wait (%p849_p11), %s694_s21, 128  }
 0x2a6   : > { %1048 = vsyncadd (%p849_p11), %s694_s21, 4294967168  ;;  %p19_p12 = scmp.ge.s32.totalorder %s1136_s30, 4   ;;  %s1337_s24 = smov %s1055_s25 }
 0x2a7   : > { %s1338_s25 = smov %s1059_s26  ;;  %s1339_s26 = smov %s1147_s10 }
 0x2a8   : > { %s1340_s27 = smov %s1136_s30  ;;  %21 = sbr.rel (!%p19_p12) target bundleno = 5 (0x5), region = 96 }
 0x2ad   :  { %700 = vsyncpa [#allocation3], 1 }
 0x2ae   :  { %702 = vsyncpa [#allocation3 + $0x1], 1 }
 0x2af   :  { %703 = vsyncpa [#allocation6], 1 }
 0x2b0   :  { %704 = vsyncpa [#allocation4], 1 }
 0x2b1   :  { %706 = vsyncpa [#allocation4 + $0x1], 1 }

</bundles_post_ra>
